<compile_context>
chip_gen: v5e
topology: v5e:2x2
jax: 0.10.0
libtpu: 0.0.40
codegen_flags: <defaults>
</compile_context>

<pallas_src>
import functools

import jax
import jax.numpy as jnp
from jax.experimental import pallas as pl
from jax.experimental.pallas import tpu as pltpu

_LANE = 128


def _round_up(x, m):
    return (x + m - 1) // m * m


def residual_block_kernel(x_ref, w1t_ref, b1_ref, w2t_ref, b2_ref, o_ref,
                          *scratch, lane_pad):
    """One batch tile: relu((x @ W1^T + b1) @ W2^T + b2 + x).

    x_ref / o_ref keep the native (tile, dim_stack) feature width (no HBM padding).
    Weights/biases are zero-padded to 128-lane multiples, so x is zero-padded into a
    VMEM scratch before the first matmul (exact: the padded weight rows are zero) and
    the padded output columns are dropped before the masked store.
    """
    x = x_ref[...]                                             # (tb, D) native width
    d = x.shape[1]
    if lane_pad:
        xpad_ref, = scratch                                    # (tb, D + lane_pad)
        # Re-zero every step: cheap, and safe under megacore grid sharding (a core
        # that never runs step 0 must not see stale pad lanes).
        xpad_ref[...] = jnp.zeros_like(xpad_ref)
        xpad_ref[:, :d] = x
        xp = xpad_ref[...]
    else:
        xp = x
    # linear1 on the MXU, f32 accumulation: (tb, Dp) @ (Dp, Hp) -> (tb, Hp).
    h = jnp.dot(xp, w1t_ref[...], preferred_element_type=jnp.float32) + b1_ref[...]
    # Feed the second matmul in the input dtype (keeps bf16 on the fast MXU path).
    # TODO(synk): for bf16 inputs this matches a bf16 PyTorch module, not an f32 ref.
    h = h.astype(x.dtype)
    # linear2: (tb, Hp) @ (Hp, Dp) -> (tb, Dp), f32 accumulation.
    y = jnp.dot(h, w2t_ref[...], preferred_element_type=jnp.float32) + b2_ref[...]
    if lane_pad:
        y = y[:, :d]                                           # drop padded columns
    # Residual add with the pre-activation x, ReLU, store at native feature width.
    o_ref[...] = jnp.maximum(y + x.astype(jnp.float32), 0.0).astype(o_ref.dtype)


def prepare_residual_block_params(w1, b1, w2, b2, *, dtype=None):
    """One-time parameter prep (hoisted out of the forward path; reuse across calls):
    transpose Linear weights to (in, out) and zero-pad feature axes to 128 lanes."""
    hidden, dim_stack = w1.shape
    assert w2.shape == (dim_stack, hidden), "w2 must be (dim_stack, hidden)"
    if dtype is None:
        dtype = w1.dtype
    dp = _round_up(dim_stack, _LANE)
    hp = _round_up(hidden, _LANE)
    w1t = jnp.zeros((dp, hp), dtype).at[:dim_stack, :hidden].set(w1.T.astype(dtype))
    w2t = jnp.zeros((hp, dp), dtype).at[:hidden, :dim_stack].set(w2.T.astype(dtype))
    b1r = jnp.zeros((1, hp), jnp.float32).at[0, :hidden].set(b1.astype(jnp.float32))
    b2r = jnp.zeros((1, dp), jnp.float32).at[0, :dim_stack].set(b2.astype(jnp.float32))
    return {"w1t": w1t, "b1": b1r, "w2t": w2t, "b2": b2r,
            "dim_stack": dim_stack, "hidden": hidden}


def _vmem_budget_and_limit():
    """Generation-aware VMEM sizing (v5e/v6e: 128 MiB, v7x: 64 MiB per core)."""
    try:
        cap = pltpu.get_tpu_info().vmem_capacity_bytes
    except Exception:
        cap = 64 * 1024 * 1024            # conservative default (v7x per-core size)
    return int(cap * 0.65), int(cap * 0.75)


def _pick_batch_tile(B, d, dp, hp, itemsize, sublane, vmem_budget, weight_buffers):
    """Balanced batch tile under a VMEM budget.

    tile ~= ceil(B / steps) rounded up to the sublane, so padded work is at most one
    sublane row per step, with >= 2 grid steps whenever B allows (keeps both v7x
    TensorCores busy and lets the x/out pipeline overlap)."""
    weight_bytes = weight_buffers * (2 * dp * hp * itemsize + (hp + dp) * 4)

    def need(t):
        io = 2 * 2 * t * d * itemsize                               # x/out, 2x buffered
        live = t * (dp * itemsize + hp * 4 + hp * itemsize + dp * 4)  # xpad, h, h-cast, y
        return weight_bytes + io + live

    max_tile = min(_round_up(B, sublane), 1024)
    while max_tile > sublane and need(max_tile) > vmem_budget:
        max_tile -= sublane
    # TODO(synk): if the resident weights alone exceed the VMEM budget (very large
    # hidden*dim_stack), add a K/N "arbitrary" grid axis over the weights instead.
    min_steps = 2 if B >= 2 * sublane else 1
    steps = max(min_steps, pl.cdiv(B, max_tile))
    tile = _round_up(pl.cdiv(B, steps), sublane)
    return max(sublane, min(tile, max_tile))


def _build_call(B, d, dp, hp, tile, dtype, itemsize, vmem_limit, single_buffer_weights):
    lane_pad = dp - d
    grid = (pl.cdiv(B, tile),)

    def const_spec(shape):
        # The weight/bias block index never changes; one resident copy is enough.
        if single_buffer_weights:
            return pl.BlockSpec(shape, lambda i: (0, 0), pipeline_mode=pl.Buffered(1))
        return pl.BlockSpec(shape, lambda i: (0, 0))

    scratch_shapes = [pltpu.VMEM((tile, dp), dtype)] if lane_pad else []

    cost = pl.CostEstimate(
        flops=4 * B * dp * hp,                                  # two matmuls
        transcendentals=0,
        bytes_accessed=2 * B * d * itemsize + 2 * dp * hp * itemsize + (hp + dp) * 4,
    )

    return pl.pallas_call(
        functools.partial(residual_block_kernel, lane_pad=lane_pad),
        out_shape=jax.ShapeDtypeStruct((B, d), dtype),
        grid_spec=pltpu.PrefetchScalarGridSpec(
            num_scalar_prefetch=0,
            grid=grid,
            in_specs=[
                pl.BlockSpec((tile, d), lambda i: (i, 0)),      # x: native width, pipelined
                const_spec((dp, hp)),                           # W1^T (resident)
                const_spec((1, hp)),                            # b1
                const_spec((hp, dp)),                           # W2^T (resident)
                const_spec((1, dp)),                            # b2
            ],
            out_specs=pl.BlockSpec((tile, d), lambda i: (i, 0)),
            scratch_shapes=scratch_shapes,
        ),
        compiler_params=pltpu.CompilerParams(
            dimension_semantics=("parallel",),                  # megacore-shard batch tiles
            vmem_limit_bytes=vmem_limit,
        ),
        cost_estimate=cost,
    )


def residual_block(x, params, *, batch_tile=None):
    """x: (B, dim_stack); params from prepare_residual_block_params()."""
    B, d = x.shape
    assert d == params["dim_stack"], "x feature dim must equal dim_stack"
    w1t, b1, w2t, b2 = params["w1t"], params["b1"], params["w2t"], params["b2"]
    dp, hp = w1t.shape

    itemsize = jnp.dtype(x.dtype).itemsize
    sublane = 32 // itemsize                                    # 8 (f32) / 16 (bf16)
    vmem_budget, vmem_limit = _vmem_budget_and_limit()

    if batch_tile is None:
        batch_tile = _pick_batch_tile(B, d, dp, hp, itemsize, sublane,
                                      vmem_budget, weight_buffers=1)
    else:
        batch_tile = max(sublane, _round_up(batch_tile, sublane))
    # A tile covering the whole batch is always legal (block dim == full array dim);
    # otherwise it is a sublane multiple and Pallas masks the ragged final block
    # (rows are independent, so masked boundary stores are exact).
    batch_tile = min(batch_tile, B)

    args = (x, w1t, b1, w2t, b2)
    try:
        out = _build_call(B, d, dp, hp, batch_tile, x.dtype, itemsize,
                          vmem_limit, single_buffer_weights=True)(*args)
    except Exception:
        # pipeline_mode=pl.Buffered(1) not supported on this jax build: fall back to
        # default double-buffered weight blocks (slightly more VMEM, same results).
        out = _build_call(B, d, dp, hp, batch_tile, x.dtype, itemsize,
                          vmem_limit, single_buffer_weights=False)(*args)
    return out


if __name__ == "__main__":
    # Small shapes consistent with Residual_block(hidden_unit, dim_stack); batch chosen
    # so the auto-tiler produces a multi-step grid (2 steps of 128 rows).
    batch = 256
    dim_stack = 32
    hidden_unit = 64

    key = jax.random.PRNGKey(0)
    kx, kw1, kb1, kw2, kb2 = jax.random.split(key, 5)

    x = jax.random.normal(kx, (batch, dim_stack), dtype=jnp.float32)
    # PyTorch-style uniform init bounds (purely synthetic).
    bound1 = 1.0 / (dim_stack ** 0.5)
    bound2 = 1.0 / (hidden_unit ** 0.5)
    w1 = jax.random.uniform(kw1, (hidden_unit, dim_stack), jnp.float32, -bound1, bound1)
    b1 = jax.random.uniform(kb1, (hidden_unit,), jnp.float32, -bound1, bound1)
    w2 = jax.random.uniform(kw2, (dim_stack, hidden_unit), jnp.float32, -bound2, bound2)
    b2 = jax.random.uniform(kb2, (dim_stack,), jnp.float32, -bound2, bound2)

    # Weight prep happens once, outside the forward path (per perf review).
    params = prepare_residual_block_params(w1, b1, w2, b2, dtype=x.dtype)

    out = residual_block(x, params)
    out = jax.block_until_ready(out)

    # Pure-JAX reference of the forward semantics.
    ref = jnp.maximum((x @ w1.T + b1) @ w2.T + b2 + x, 0.0)
    assert out.shape == ref.shape, "shape mismatch vs reference"
    assert jnp.allclose(out, ref, atol=1e-4, rtol=1e-4), "mismatch vs reference"

    print("KERNEL_OK")
</pallas_src>

<mosaic_0001>
module attributes {stable_mosaic.version = 11 : i64} {
  func.func @residual_block_kernel(%arg0: i32, %arg1: memref<128x32xf32, #tpu.memory_space<vmem>>, %arg2: memref<128x128xf32, #tpu.memory_space<vmem>>, %arg3: memref<1x128xf32, #tpu.memory_space<vmem>>, %arg4: memref<128x128xf32, #tpu.memory_space<vmem>>, %arg5: memref<1x128xf32, #tpu.memory_space<vmem>>, %arg6: memref<128x32xf32, #tpu.memory_space<vmem>>, %arg7: memref<128x128xf32, #tpu.memory_space<vmem>>) attributes {dimension_semantics = [#tpu.dimension_semantics<parallel>], iteration_bounds = array<i64: 2>, scalar_prefetch = 0 : i64, scratch_operands = 1 : i64, tpu.core_type = #tpu.core_type<tc>, window_params = [{transform_indices = @transform_0, window_bounds = array<i64: 128, 32>}, {pipeline_mode = #tpu.pipeline_mode<synchronous>, transform_indices = @transform_1, window_bounds = array<i64: 128, 128>}, {pipeline_mode = #tpu.pipeline_mode<synchronous>, transform_indices = @transform_2, window_bounds = array<i64: 1, 128>}, {pipeline_mode = #tpu.pipeline_mode<synchronous>, transform_indices = @transform_3, window_bounds = array<i64: 128, 128>}, {pipeline_mode = #tpu.pipeline_mode<synchronous>, transform_indices = @transform_4, window_bounds = array<i64: 1, 128>}, {transform_indices = @transform_5, window_bounds = array<i64: 128, 32>}]} {
    %c0 = arith.constant 0 : index
    %c0_0 = arith.constant 0 : index
    %0 = vector.load %arg1[%c0, %c0_0] : memref<128x32xf32, #tpu.memory_space<vmem>>, vector<128x32xf32>
    %cst = arith.constant 0.000000e+00 : f32
    %1 = vector.broadcast %cst : f32 to vector<128x128xf32>
    %c0_1 = arith.constant 0 : index
    %c0_2 = arith.constant 0 : index
    %2 = vector.load %arg7[%c0_1, %c0_2] : memref<128x128xf32, #tpu.memory_space<vmem>>, vector<128x128xf32>
    tpu.vector_store %arg7[%c0_1, %c0_2], %1 {strides = array<i32>} : memref<128x128xf32, #tpu.memory_space<vmem>>, vector<128x128xf32>,
    %c0_3 = arith.constant 0 : index
    %c0_4 = arith.constant 0 : index
    %3 = vector.load %arg7[%c0_3, %c0_4] : memref<128x128xf32, #tpu.memory_space<vmem>>, vector<128x32xf32>
    tpu.vector_store %arg7[%c0_3, %c0_4], %0 {strides = array<i32>} : memref<128x128xf32, #tpu.memory_space<vmem>>, vector<128x32xf32>,
    %c0_5 = arith.constant 0 : index
    %c0_6 = arith.constant 0 : index
    %4 = vector.load %arg7[%c0_5, %c0_6] : memref<128x128xf32, #tpu.memory_space<vmem>>, vector<128x128xf32>
    %c0_7 = arith.constant 0 : index
    %c0_8 = arith.constant 0 : index
    %5 = vector.load %arg2[%c0_7, %c0_8] : memref<128x128xf32, #tpu.memory_space<vmem>>, vector<128x128xf32>
    %cst_9 = arith.constant dense<0.000000e+00> : vector<128x128xf32>
    %6 = tpu.matmul %4, %5, %cst_9 {dimension_numbers = #tpu.dot_dimension_numbers<[1], [0], [0], [1], [0, 0, 1, 1], [], []>} : vector<128x128xf32>, vector<128x128xf32>, vector<128x128xf32> -> vector<128x128xf32>
    %c0_10 = arith.constant 0 : index
    %c0_11 = arith.constant 0 : index
    %7 = vector.load %arg3[%c0_10, %c0_11] : memref<1x128xf32, #tpu.memory_space<vmem>>, vector<1x128xf32>
    %8 = vector.broadcast %7 : vector<1x128xf32> to vector<128x128xf32>
    %9 = arith.addf %6, %8 : vector<128x128xf32>
    %c0_12 = arith.constant 0 : index
    %c0_13 = arith.constant 0 : index
    %10 = vector.load %arg4[%c0_12, %c0_13] : memref<128x128xf32, #tpu.memory_space<vmem>>, vector<128x128xf32>
    %cst_14 = arith.constant dense<0.000000e+00> : vector<128x128xf32>
    %11 = tpu.matmul %9, %10, %cst_14 {dimension_numbers = #tpu.dot_dimension_numbers<[1], [0], [0], [1], [0, 0, 1, 1], [], []>} : vector<128x128xf32>, vector<128x128xf32>, vector<128x128xf32> -> vector<128x128xf32>
    %c0_15 = arith.constant 0 : index
    %c0_16 = arith.constant 0 : index
    %12 = vector.load %arg5[%c0_15, %c0_16] : memref<1x128xf32, #tpu.memory_space<vmem>>, vector<1x128xf32>
    %13 = vector.broadcast %12 : vector<1x128xf32> to vector<128x128xf32>
    %14 = arith.addf %11, %13 : vector<128x128xf32>
    %15 = vector.extract_strided_slice %14 {offsets = [0, 0], sizes = [128, 32], strides = [1, 1]} : vector<128x128xf32> to vector<128x32xf32>
    %16 = arith.addf %15, %0 : vector<128x32xf32>
    %cst_17 = arith.constant 0.000000e+00 : f32
    %17 = vector.broadcast %cst_17 : f32 to vector<128x32xf32>
    %18 = arith.maximumf %16, %17 : vector<128x32xf32>
    %c0_18 = arith.constant 0 : index
    %c0_19 = arith.constant 0 : index
    %19 = vector.load %arg6[%c0_18, %c0_19] : memref<128x32xf32, #tpu.memory_space<vmem>>, vector<128x32xf32>
    tpu.vector_store %arg6[%c0_18, %c0_19], %18 {strides = array<i32>} : memref<128x32xf32, #tpu.memory_space<vmem>>, vector<128x32xf32>,
    return
  }
  func.func @transform_0(%arg0: i32) -> (i32, i32) {
    %c0_i32 = arith.constant 0 : i32
    %c0_i32_0 = arith.constant 0 : i32
    return %arg0, %c0_i32 : i32, i32
  }
  func.func @transform_1(%arg0: i32) -> (i32, i32) {
    %c0_i32 = arith.constant 0 : i32
    %c0_i32_0 = arith.constant 0 : i32
    %c0_i32_1 = arith.constant 0 : i32
    return %c0_i32, %c0_i32_0 : i32, i32
  }
  func.func @transform_2(%arg0: i32) -> (i32, i32) {
    %c0_i32 = arith.constant 0 : i32
    %c0_i32_0 = arith.constant 0 : i32
    %c0_i32_1 = arith.constant 0 : i32
    return %c0_i32, %c0_i32_0 : i32, i32
  }
  func.func @transform_3(%arg0: i32) -> (i32, i32) {
    %c0_i32 = arith.constant 0 : i32
    %c0_i32_0 = arith.constant 0 : i32
    %c0_i32_1 = arith.constant 0 : i32
    return %c0_i32, %c0_i32_0 : i32, i32
  }
  func.func @transform_4(%arg0: i32) -> (i32, i32) {
    %c0_i32 = arith.constant 0 : i32
    %c0_i32_0 = arith.constant 0 : i32
    %c0_i32_1 = arith.constant 0 : i32
    return %c0_i32, %c0_i32_0 : i32, i32
  }
  func.func @transform_5(%arg0: i32) -> (i32, i32) {
    %c0_i32 = arith.constant 0 : i32
    %c0_i32_0 = arith.constant 0 : i32
    return %arg0, %c0_i32 : i32, i32
  }
}

module attributes {stable_mosaic.version = 11 : i64} {
  func.func @residual_block_kernel(%arg0: i32, %arg1: memref<128x32xf32, #tpu.memory_space<vmem>>, %arg2: memref<128x128xf32, #tpu.memory_space<vmem>>, %arg3: memref<1x128xf32, #tpu.memory_space<vmem>>, %arg4: memref<128x128xf32, #tpu.memory_space<vmem>>, %arg5: memref<1x128xf32, #tpu.memory_space<vmem>>, %arg6: memref<128x32xf32, #tpu.memory_space<vmem>>, %arg7: memref<128x128xf32, #tpu.memory_space<vmem>>) attributes {dimension_semantics = [#tpu.dimension_semantics<parallel>], iteration_bounds = array<i64: 2>, scalar_prefetch = 0 : i64, scratch_operands = 1 : i64, tpu.core_type = #tpu.core_type<tc>, window_params = [{transform_indices = @transform_0, window_bounds = array<i64: 128, 32>}, {pipeline_mode = #tpu.pipeline_mode<synchronous>, transform_indices = @transform_1, window_bounds = array<i64: 128, 128>}, {pipeline_mode = #tpu.pipeline_mode<synchronous>, transform_indices = @transform_2, window_bounds = array<i64: 1, 128>}, {pipeline_mode = #tpu.pipeline_mode<synchronous>, transform_indices = @transform_3, window_bounds = array<i64: 128, 128>}, {pipeline_mode = #tpu.pipeline_mode<synchronous>, transform_indices = @transform_4, window_bounds = array<i64: 1, 128>}, {transform_indices = @transform_5, window_bounds = array<i64: 128, 32>}]} {
    %c0 = arith.constant 0 : index
    %c0_0 = arith.constant 0 : index
    %0 = vector.load %arg1[%c0, %c0_0] : memref<128x32xf32, #tpu.memory_space<vmem>>, vector<128x32xf32>
    %cst = arith.constant 0.000000e+00 : f32
    %1 = vector.broadcast %cst : f32 to vector<128x128xf32>
    %c0_1 = arith.constant 0 : index
    %c0_2 = arith.constant 0 : index
    %2 = vector.load %arg7[%c0_1, %c0_2] : memref<128x128xf32, #tpu.memory_space<vmem>>, vector<128x128xf32>
    tpu.vector_store %arg7[%c0_1, %c0_2], %1 {strides = array<i32>} : memref<128x128xf32, #tpu.memory_space<vmem>>, vector<128x128xf32>,
    %c0_3 = arith.constant 0 : index
    %c0_4 = arith.constant 0 : index
    %3 = vector.load %arg7[%c0_3, %c0_4] : memref<128x128xf32, #tpu.memory_space<vmem>>, vector<128x32xf32>
    tpu.vector_store %arg7[%c0_3, %c0_4], %0 {strides = array<i32>} : memref<128x128xf32, #tpu.memory_space<vmem>>, vector<128x32xf32>,
    %c0_5 = arith.constant 0 : index
    %c0_6 = arith.constant 0 : index
    %4 = vector.load %arg7[%c0_5, %c0_6] : memref<128x128xf32, #tpu.memory_space<vmem>>, vector<128x128xf32>
    %c0_7 = arith.constant 0 : index
    %c0_8 = arith.constant 0 : index
    %5 = vector.load %arg2[%c0_7, %c0_8] : memref<128x128xf32, #tpu.memory_space<vmem>>, vector<128x128xf32>
    %cst_9 = arith.constant dense<0.000000e+00> : vector<128x128xf32>
    %6 = tpu.matmul %4, %5, %cst_9 {dimension_numbers = #tpu.dot_dimension_numbers<[1], [0], [0], [1], [0, 0, 1, 1], [], []>} : vector<128x128xf32>, vector<128x128xf32>, vector<128x128xf32> -> vector<128x128xf32>
    %c0_10 = arith.constant 0 : index
    %c0_11 = arith.constant 0 : index
    %7 = vector.load %arg3[%c0_10, %c0_11] : memref<1x128xf32, #tpu.memory_space<vmem>>, vector<1x128xf32>
    %8 = vector.broadcast %7 : vector<1x128xf32> to vector<128x128xf32>
    %9 = arith.addf %6, %8 : vector<128x128xf32>
    %c0_12 = arith.constant 0 : index
    %c0_13 = arith.constant 0 : index
    %10 = vector.load %arg4[%c0_12, %c0_13] : memref<128x128xf32, #tpu.memory_space<vmem>>, vector<128x128xf32>
    %cst_14 = arith.constant dense<0.000000e+00> : vector<128x128xf32>
    %11 = tpu.matmul %9, %10, %cst_14 {dimension_numbers = #tpu.dot_dimension_numbers<[1], [0], [0], [1], [0, 0, 1, 1], [], []>} : vector<128x128xf32>, vector<128x128xf32>, vector<128x128xf32> -> vector<128x128xf32>
    %c0_15 = arith.constant 0 : index
    %c0_16 = arith.constant 0 : index
    %12 = vector.load %arg5[%c0_15, %c0_16] : memref<1x128xf32, #tpu.memory_space<vmem>>, vector<1x128xf32>
    %13 = vector.broadcast %12 : vector<1x128xf32> to vector<128x128xf32>
    %14 = arith.addf %11, %13 : vector<128x128xf32>
    %15 = vector.extract_strided_slice %14 {offsets = [0, 0], sizes = [128, 32], strides = [1, 1]} : vector<128x128xf32> to vector<128x32xf32>
    %16 = arith.addf %15, %0 : vector<128x32xf32>
    %cst_17 = arith.constant 0.000000e+00 : f32
    %17 = vector.broadcast %cst_17 : f32 to vector<128x32xf32>
    %18 = arith.maximumf %16, %17 : vector<128x32xf32>
    %c0_18 = arith.constant 0 : index
    %c0_19 = arith.constant 0 : index
    %19 = vector.load %arg6[%c0_18, %c0_19] : memref<128x32xf32, #tpu.memory_space<vmem>>, vector<128x32xf32>
    tpu.vector_store %arg6[%c0_18, %c0_19], %18 {strides = array<i32>} : memref<128x32xf32, #tpu.memory_space<vmem>>, vector<128x32xf32>,
    return
  }
  func.func @transform_0(%arg0: i32) -> (i32, i32) {
    %c0_i32 = arith.constant 0 : i32
    %c0_i32_0 = arith.constant 0 : i32
    return %arg0, %c0_i32 : i32, i32
  }
  func.func @transform_1(%arg0: i32) -> (i32, i32) {
    %c0_i32 = arith.constant 0 : i32
    %c0_i32_0 = arith.constant 0 : i32
    %c0_i32_1 = arith.constant 0 : i32
    return %c0_i32, %c0_i32_0 : i32, i32
  }
  func.func @transform_2(%arg0: i32) -> (i32, i32) {
    %c0_i32 = arith.constant 0 : i32
    %c0_i32_0 = arith.constant 0 : i32
    %c0_i32_1 = arith.constant 0 : i32
    return %c0_i32, %c0_i32_0 : i32, i32
  }
  func.func @transform_3(%arg0: i32) -> (i32, i32) {
    %c0_i32 = arith.constant 0 : i32
    %c0_i32_0 = arith.constant 0 : i32
    %c0_i32_1 = arith.constant 0 : i32
    return %c0_i32, %c0_i32_0 : i32, i32
  }
  func.func @transform_4(%arg0: i32) -> (i32, i32) {
    %c0_i32 = arith.constant 0 : i32
    %c0_i32_0 = arith.constant 0 : i32
    %c0_i32_1 = arith.constant 0 : i32
    return %c0_i32, %c0_i32_0 : i32, i32
  }
  func.func @transform_5(%arg0: i32) -> (i32, i32) {
    %c0_i32 = arith.constant 0 : i32
    %c0_i32_0 = arith.constant 0 : i32
    return %arg0, %c0_i32 : i32, i32
  }
}

</mosaic_0001>

<bundles_post_ra>
// kernel: tpu_custom_call.1
= control target key start
LH: loop header
LB: loop body
LE: loop exit
PB: predicated region body
PF: predicated region fallthrough
CT: control target
= control target key end

     0   :  { %s660_s18 = smov 0   ;;  %s936_s0 = inlined_call_operand.vmem [shape: f32[256,32], index: 0, kind: input, shape index: {}]   ;;  %s937_s1 = inlined_call_operand.vmem [shape: f32[128,128], index: 1, kind: input, shape index: {}]   ;;  %s938_s2 = inlined_call_operand.vmem [shape: f32[1,128], index: 2, kind: input, shape index: {}]   ;;  %s939_s3 = inlined_call_operand.vmem [shape: f32[128,128], index: 3, kind: input, shape index: {}]   ;;  %s940_s4 = inlined_call_operand.vmem [shape: f32[1,128], index: 4, kind: input, shape index: {}]   ;;  %s941_s5 = inlined_call_operand.vmem [shape: f32[256,32], index: 5, kind: output, shape index: {}]  }
   0x1 LB: > { %s567_s19 = sadd.s32 4294967295, %s627_s18   ;;  %p571_p0 = scmp.ge.s32.totalorder %s627_s18, 1  ;;  %s627_s18 = sphi %s660_s18, %s15_s18  }
   0x2   : > { %p188_p1 = scmp.lt.s32.totalorder %s627_s18, 3 }
   0x4   : > { %p189_p2 = pnand %p571_p0, %p188_p1 }
   0x5   : > { %s572_s24 = sshll.u32 (!%p189_p2), %s567_s19, 4 }
   0x6   : > { %192 = sbr.rel (%p189_p2) target bundleno = 372 (0x174), region = 40  ;;  %p217_p3 = scmp.lt.s32.totalorder (!%p189_p2), %s572_s24, 31 }
   0xb   : > { %v308_v0 = vld [vmem:[%s937_s1 + $0x78] sm:$0xff]  ;;  %v307_v1 = vld [vmem:[%s937_s1 + $0x70] sm:$0xff]  ;;  %v629_v2 = vmov 0.0   ;;  %v306_v3 = vld [vmem:[%s937_s1 + $0x68] sm:$0xff]  ;;  %s943_s24 = smov (!%p217_p3, %s572_s24), 31  ;;  %vm260_vm0 = vcmask 261120  }
   0xc   : > { %578 = vmatpush.msra.mxu2 %v308_v0  ;;  %313 = vmatpush.msra.mxu0 %v308_v0  ;;  %252 = vst [vmem:[#allocation2 + $0x40] sm:$0xff] %v629_v2  ;;  %v305_v4 = vld [vmem:[%s937_s1 + $0x60] sm:$0xff]  ;;  %s573_s29 = sshll.u32 %s943_s24, 3  ;;  %v304_v5 = vld [vmem:[%s937_s1 + $0x58] sm:$0xff]  ;;  %v303_v7 = vld [vmem:[%s937_s1 + $0x50] sm:$0xff] }
   0xd   : > { %244 = vst [vmem:[#allocation2] sm:$0xff] %v629_v2  ;;  %s691_s9 = scalar_lea.vmem %s936_s0, %s573_s29  ;;  %v302_v8 = vld [vmem:[%s937_s1 + $0x48] sm:$0xff]  ;;  %v301_v9 = vld [vmem:[%s937_s1 + $0x40] sm:$0xff]  ;;  %v300_v10 = vld [vmem:[%s937_s1 + $0x38] sm:$0xff]  ;;  %s869_s28 = scalar_lea.vmem %s941_s5, %s573_s29 }
   0xe   : > { %579 = vmatpush.msra.mxu2 %v307_v1  ;;  %314 = vmatpush.msra.mxu0 %v307_v1  ;;  %245 = vst [vmem:[#allocation2 + $0x8] sm:$0xff] %v629_v2  ;;  %v694_v6 = vld [vmem:[%s691_s9 + $0x40] sm:$0xff]  ;;  %v711_v11 = vld [vmem:[%s691_s9 + $0x48] sm:$0xff]  ;;  %v299_v12 = vld [vmem:[%s937_s1 + $0x30] sm:$0xff] }
   0xf   : > { %246 = vst [vmem:[#allocation2 + $0x10] sm:$0xff] %v629_v2  ;;  %v717_v13 = vld [vmem:[%s691_s9] sm:$0xff]  ;;  %v720_v14 = vld [vmem:[%s691_s9 + $0x50] sm:$0xff]  ;;  %v298_v15 = vld [vmem:[%s937_s1 + $0x28] sm:$0xff] }
  0x10   : > { %580 = vmatpush.msra.mxu2 %v306_v3  ;;  %315 = vmatpush.msra.mxu0 %v306_v3  ;;  %247 = vst [vmem:[#allocation2 + $0x18] sm:$0xff] %v629_v2  ;;  %v728_v16 = vld [vmem:[%s691_s9 + $0x8] sm:$0xff]  ;;  %v733_v17 = vld [vmem:[%s691_s9 + $0x58] sm:$0xff]  ;;  %v297_v18 = vld [vmem:[%s937_s1 + $0x20] sm:$0xff] }
  0x11   : > { %248 = vst [vmem:[#allocation2 + $0x20] sm:$0xff] %v629_v2  ;;  %v741_v19 = vld [vmem:[%s691_s9 + $0x10] sm:$0xff]  ;;  %v296_v20 = vld [vmem:[%s937_s1 + $0x18] sm:$0xff]  ;;  %v753_v21 = vld [vmem:[%s691_s9 + $0x60] sm:$0xff] }
  0x12   : > { %581 = vmatpush.msra.mxu2 %v305_v4  ;;  %316 = vmatpush.msra.mxu0 %v305_v4  ;;  %249 = vst [vmem:[#allocation2 + $0x28] sm:$0xff] %v629_v2  ;;  %v295_v22 = vld [vmem:[%s937_s1 + $0x10] sm:$0xff]  ;;  %v294_v23 = vld [vmem:[%s937_s1 + $0x8] sm:$0xff]  ;;  %v764_v24 = vld [vmem:[%s691_s9 + $0x18] sm:$0xff] }
  0x13   : > { %269 = vst.msk [vmem:[#allocation2 + $0x40] sm:$0xff] %vm260_vm0, %v694_v6  ;;  %v293_v25 = vld [vmem:[%s937_s1] sm:$0xff]  ;;  %v772_v28 = vld [vmem:[%s691_s9 + $0x68] sm:$0xff]  ;;  %v782_v32 = vld [vmem:[%s691_s9 + $0x70] sm:$0xff] }
  0x14   : > { %582 = vmatpush.msra.mxu2 %v304_v5  ;;  %317 = vmatpush.msra.mxu0 %v304_v5  ;;  %250 = vst [vmem:[#allocation2 + $0x30] sm:$0xff] %v629_v2  ;;  %v777_v29 = vld [vmem:[%s691_s9 + $0x20] sm:$0xff]  ;;  %v787_v33 = vld [vmem:[%s691_s9 + $0x28] sm:$0xff]  ;;  %v792_v36 = vld [vmem:[%s691_s9 + $0x78] sm:$0xff] }
  0x15   : > { %251 = vst [vmem:[#allocation2 + $0x38] sm:$0xff] %v629_v2  ;;  %v797_v37 = vld [vmem:[%s691_s9 + $0x30] sm:$0xff]  ;;  %v802_v40 = vld [vmem:[%s691_s9 + $0x38] sm:$0xff]  ;;  %v391_v43 = vld [vmem:[%s939_s3 + $0x68] sm:$0xff] }
  0x16   : > { %583 = vmatpush.msra.mxu2 %v303_v7  ;;  %318 = vmatpush.msra.mxu0 %v303_v7  ;;  %253 = vst [vmem:[#allocation2 + $0x48] sm:$0xff] %v629_v2  ;;  %v393_v41 = vld [vmem:[%s939_s3 + $0x78] sm:$0xff]  ;;  %v392_v42 = vld [vmem:[%s939_s3 + $0x70] sm:$0xff]  ;;  %v390_v44 = vld [vmem:[%s939_s3 + $0x60] sm:$0xff] }
  0x17   : > { %254 = vst [vmem:[#allocation2 + $0x50] sm:$0xff] %v629_v2  ;;  %594 = vmatpush.msra.mxu3 %v393_v41  ;;  %398 = vmatpush.msra.mxu1 %v393_v41  ;;  %v389_v47 = vld [vmem:[%s939_s3 + $0x58] sm:$0xff]  ;;  %v388_v48 = vld [vmem:[%s939_s3 + $0x50] sm:$0xff]  ;;  %v387_v49 = vld [vmem:[%s939_s3 + $0x48] sm:$0xff] }
  0x18   : > { %584 = vmatpush.msra.mxu2 %v302_v8  ;;  %319 = vmatpush.msra.mxu0 %v302_v8  ;;  %255 = vst [vmem:[#allocation2 + $0x58] sm:$0xff] %v629_v2  ;;  %v386_v50 = vld [vmem:[%s939_s3 + $0x40] sm:$0xff]  ;;  %v385_v53 = vld [vmem:[%s939_s3 + $0x38] sm:$0xff]  ;;  %v384_v54 = vld [vmem:[%s939_s3 + $0x30] sm:$0xff] }
  0x19   : > { %256 = vst [vmem:[#allocation2 + $0x60] sm:$0xff] %v629_v2  ;;  %595 = vmatpush.msra.mxu3 %v392_v42  ;;  %399 = vmatpush.msra.mxu1 %v392_v42  ;;  %v383_v55 = vld [vmem:[%s939_s3 + $0x28] sm:$0xff]  ;;  %v382_v56 = vld [vmem:[%s939_s3 + $0x20] sm:$0xff]  ;;  %v381_v59 = vld [vmem:[%s939_s3 + $0x18] sm:$0xff] }
  0x1a   : > { %585 = vmatpush.msra.mxu2 %v301_v9  ;;  %320 = vmatpush.msra.mxu0 %v301_v9  ;;  %257 = vst [vmem:[#allocation2 + $0x68] sm:$0xff] %v629_v2  ;;  %v285_v26 = vld [vmem:[#allocation2 + $0x40] sm:$0xff]  ;;  %v380_v60 = vld [vmem:[%s939_s3 + $0x10] sm:$0xff]  ;;  %v379_v63 = vld [vmem:[%s939_s3 + $0x8] sm:$0xff] }
  0x1b   : > { %258 = vst [vmem:[#allocation2 + $0x70] sm:$0xff] %v629_v2  ;;  %596 = vmatpush.msra.mxu3 %v391_v43  ;;  %400 = vmatpush.msra.mxu1 %v391_v43  ;;  %v378_v0 = vld [vmem:[%s939_s3] sm:$0xff] }
  0x1c   : > { %586 = vmatpush.msra.mxu2 %v300_v10  ;;  %321 = vmatpush.msra.mxu0 %v300_v10  ;;  %259 = vst [vmem:[#allocation2 + $0x78] sm:$0xff] %v629_v2  ;;  %v619_v1 = vld [vmem:[%s938_s2] ss:$0 sm:$0xff] }
  0x1d   : > { %270 = vst.msk [vmem:[#allocation2 + $0x48] sm:$0xff] %vm260_vm0, %v711_v11  ;;  %597 = vmatpush.msra.mxu3 %v390_v44  ;;  %401 = vmatpush.msra.mxu1 %v390_v44 }
  0x1e   : > { %587 = vmatpush.msra.mxu2 %v299_v12  ;;  %322 = vmatpush.msra.mxu0 %v299_v12  ;;  %261 = vst.msk [vmem:[#allocation2] sm:$0xff] %vm260_vm0, %v717_v13 }
  0x1f   : > { %271 = vst.msk [vmem:[#allocation2 + $0x50] sm:$0xff] %vm260_vm0, %v720_v14  ;;  %598 = vmatpush.msra.mxu3 %v389_v47  ;;  %402 = vmatpush.msra.mxu1 %v389_v47 }
  0x20   : > { %588 = vmatpush.msra.mxu2 %v298_v15  ;;  %323 = vmatpush.msra.mxu0 %v298_v15  ;;  %262 = vst.msk [vmem:[#allocation2 + $0x8] sm:$0xff] %vm260_vm0, %v728_v16 }
  0x21   : > { %272 = vst.msk [vmem:[#allocation2 + $0x58] sm:$0xff] %vm260_vm0, %v733_v17  ;;  %599 = vmatpush.msra.mxu3 %v388_v48  ;;  %403 = vmatpush.msra.mxu1 %v388_v48 }
  0x22   : > { %589 = vmatpush.msra.mxu2 %v297_v18  ;;  %324 = vmatpush.msra.mxu0 %v297_v18  ;;  %263 = vst.msk [vmem:[#allocation2 + $0x10] sm:$0xff] %vm260_vm0, %v741_v19 }
  0x23   : > { %273 = vst.msk [vmem:[#allocation2 + $0x60] sm:$0xff] %vm260_vm0, %v753_v21  ;;  %600 = vmatpush.msra.mxu3 %v387_v49  ;;  %404 = vmatpush.msra.mxu1 %v387_v49 }
  0x24   : > { %590 = vmatpush.msra.mxu2 %v296_v20  ;;  %325 = vmatpush.msra.mxu0 %v296_v20  ;;  %264 = vst.msk [vmem:[#allocation2 + $0x18] sm:$0xff] %vm260_vm0, %v764_v24  ;;  %v286_v30 = vld [vmem:[#allocation2 + $0x48] sm:$0xff] }
  0x25   : > { %v277_v27 = vld [vmem:[#allocation2] sm:$0xff]  ;;  %274 = vst.msk [vmem:[#allocation2 + $0x68] sm:$0xff] %vm260_vm0, %v772_v28  ;;  %601 = vmatpush.msra.mxu3 %v386_v50  ;;  %405 = vmatpush.msra.mxu1 %v386_v50 }
  0x26   : > { %591 = vmatpush.msra.mxu2 %v295_v22  ;;  %326 = vmatpush.msra.mxu0 %v295_v22  ;;  %265 = vst.msk [vmem:[#allocation2 + $0x20] sm:$0xff] %vm260_vm0, %v777_v29  ;;  %v287_v34 = vld [vmem:[#allocation2 + $0x50] sm:$0xff]  ;;  %v860_v50 = vld [vmem:[%s940_s4] ss:$0 sm:$0xff] }
  0x27   : > { %v278_v31 = vld [vmem:[#allocation2 + $0x8] sm:$0xff]  ;;  %275 = vst.msk [vmem:[#allocation2 + $0x70] sm:$0xff] %vm260_vm0, %v782_v32  ;;  %602 = vmatpush.msra.mxu3 %v385_v53  ;;  %406 = vmatpush.msra.mxu1 %v385_v53 }
  0x28   : > { %592 = vmatpush.msra.mxu2 %v294_v23  ;;  %327 = vmatpush.msra.mxu0 %v294_v23  ;;  %266 = vst.msk [vmem:[#allocation2 + $0x28] sm:$0xff] %vm260_vm0, %v787_v33  ;;  %v288_v38 = vld [vmem:[#allocation2 + $0x58] sm:$0xff] }
  0x29   : > { %v279_v35 = vld [vmem:[#allocation2 + $0x10] sm:$0xff]  ;;  %276 = vst.msk [vmem:[#allocation2 + $0x78] sm:$0xff] %vm260_vm0, %v792_v36  ;;  %603 = vmatpush.msra.mxu3 %v384_v54  ;;  %407 = vmatpush.msra.mxu1 %v384_v54 }
  0x2a   : > { %593 = vmatpush.msra.mxu2 %v293_v25  ;;  %328 = vmatpush.msra.mxu0 %v293_v25  ;;  %267 = vst.msk [vmem:[#allocation2 + $0x30] sm:$0xff] %vm260_vm0, %v797_v37  ;;  %v289_v45 = vld [vmem:[#allocation2 + $0x60] sm:$0xff] }
  0x2b   : > { %353 = vmatmul.f32.vlgmr.msra.gmra.mxu2 %v285_v26  ;;  %329 = vmatmul.f32.vlgmr.msra.gmra.mxu0 %v277_v27  ;;  %v280_v39 = vld [vmem:[#allocation2 + $0x18] sm:$0xff]  ;;  %268 = vst.msk [vmem:[#allocation2 + $0x38] sm:$0xff] %vm260_vm0, %v802_v40 }
  0x2c   : > { %v290_v51 = vld [vmem:[#allocation2 + $0x68] sm:$0xff]  ;;  %604 = vmatpush.msra.mxu3 %v383_v55  ;;  %408 = vmatpush.msra.mxu1 %v383_v55 }
  0x2d   : > { %v281_v46 = vld [vmem:[#allocation2 + $0x20] sm:$0xff] }
  0x2e   : > { %v291_v57 = vld [vmem:[#allocation2 + $0x70] sm:$0xff]  ;;  %605 = vmatpush.msra.mxu3 %v382_v56  ;;  %409 = vmatpush.msra.mxu1 %v382_v56 }
  0x2f   : > { %v282_v52 = vld [vmem:[#allocation2 + $0x28] sm:$0xff] }
  0x30   : > { %606 = vmatpush.msra.mxu3 %v381_v59  ;;  %410 = vmatpush.msra.mxu1 %v381_v59  ;;  %v292_v61 = vld [vmem:[#allocation2 + $0x78] sm:$0xff] }
  0x31   : > { %v283_v58 = vld [vmem:[#allocation2 + $0x30] sm:$0xff] }
  0x32   : > { %607 = vmatpush.msra.mxu3 %v380_v60  ;;  %411 = vmatpush.msra.mxu1 %v380_v60  ;;  %v284_v62 = vld [vmem:[#allocation2 + $0x38] sm:$0xff] }
  0x33   : > { %356 = vmatmul.f32.gmra.mxu2 %v286_v30  ;;  %332 = vmatmul.f32.gmra.mxu0 %v278_v31 }
  0x34   : > { %608 = vmatpush.msra.mxu3 %v379_v63  ;;  %412 = vmatpush.msra.mxu1 %v379_v63 }
  0x36   : > { %609 = vmatpush.msra.mxu3 %v378_v0  ;;  %413 = vmatpush.msra.mxu1 %v378_v0 }
  0x3b   : > { %359 = vmatmul.f32.gmra.mxu2 %v287_v34  ;;  %335 = vmatmul.f32.gmra.mxu0 %v279_v35 }
  0x43   : > { %362 = vmatmul.f32.gmra.mxu2 %v288_v38  ;;  %338 = vmatmul.f32.gmra.mxu0 %v280_v39 }
  0x4b   : > { %365 = vmatmul.f32.gmra.mxu2 %v289_v45  ;;  %341 = vmatmul.f32.gmra.mxu0 %v281_v46 }
  0x53   : > { %368 = vmatmul.f32.gmra.mxu2 %v290_v51  ;;  %344 = vmatmul.f32.gmra.mxu0 %v282_v52 }
  0x5b   : > { %371 = vmatmul.f32.gmra.mxu2 %v291_v57  ;;  %347 = vmatmul.f32.gmra.mxu0 %v283_v58 }
  0x63   : > { %374 = vmatmul.f32.gmra.mxu2 %v292_v61  ;;  %350 = vmatmul.f32.gmra.mxu0 %v284_v62 }
  0xa8   : > { %v330_v2 = vpop.f32.mrf.mxu0 }
  0xa9   : > { %v331_v3 = vadd.f32 %v619_v1, %v330_v2 }
  0xab   : > { %414 = vmatmul.f32.vlgmr.msra.gmra.mxu1 %v331_v3 }
  0xae   : > { %v354_v4 = vpop.f32.mrf.mxu2 }
  0xaf   : > { %v355_v5 = vadd.f32 %v619_v1, %v354_v4 }
  0xb0   : > { %v333_v7 = vpop.f32.mrf.mxu0 }
  0xb1   : > { %438 = vmatmul.f32.vlgmr.msra.gmra.mxu3 %v355_v5  ;;  %v334_v8 = vadd.f32 %v619_v1, %v333_v7 }
  0xb3   : > { %417 = vmatmul.f32.gmra.mxu1 %v334_v8 }
  0xb6   : > { %v357_v9 = vpop.f32.mrf.mxu2 }
  0xb7   : > { %v358_v10 = vadd.f32 %v619_v1, %v357_v9 }
  0xb8   : > { %v336_v12 = vpop.f32.mrf.mxu0 }
  0xb9   : > { %441 = vmatmul.f32.gmra.mxu3 %v358_v10  ;;  %v337_v15 = vadd.f32 %v619_v1, %v336_v12 }
  0xbb   : > { %420 = vmatmul.f32.gmra.mxu1 %v337_v15 }
  0xbe   : > { %v360_v18 = vpop.f32.mrf.mxu2 }
  0xbf   : > { %v361_v20 = vadd.f32 %v619_v1, %v360_v18 }
  0xc0   : > { %v339_v22 = vpop.f32.mrf.mxu0 }
  0xc1   : > { %444 = vmatmul.f32.gmra.mxu3 %v361_v20  ;;  %v340_v23 = vadd.f32 %v619_v1, %v339_v22 }
  0xc3   : > { %423 = vmatmul.f32.gmra.mxu1 %v340_v23 }
  0xc6   : > { %v363_v25 = vpop.f32.mrf.mxu2 }
  0xc7   : > { %v364_v26 = vadd.f32 %v619_v1, %v363_v25 }
  0xc8   : > { %v342_v27 = vpop.f32.mrf.mxu0 }
  0xc9   : > { %447 = vmatmul.f32.gmra.mxu3 %v364_v26  ;;  %v343_v30 = vadd.f32 %v619_v1, %v342_v27 }
  0xcb   : > { %426 = vmatmul.f32.gmra.mxu1 %v343_v30 }
  0xce   : > { %v366_v31 = vpop.f32.mrf.mxu2 }
  0xcf   : > { %v367_v34 = vadd.f32 %v619_v1, %v366_v31 }
  0xd0   : > { %v345_v35 = vpop.f32.mrf.mxu0 }
  0xd1   : > { %450 = vmatmul.f32.gmra.mxu3 %v367_v34  ;;  %v346_v38 = vadd.f32 %v619_v1, %v345_v35 }
  0xd3   : > { %429 = vmatmul.f32.gmra.mxu1 %v346_v38 }
  0xd6   : > { %v369_v39 = vpop.f32.mrf.mxu2 }
  0xd7   : > { %v370_v41 = vadd.f32 %v619_v1, %v369_v39 }
  0xd8   : > { %v348_v42 = vpop.f32.mrf.mxu0 }
  0xd9   : > { %453 = vmatmul.f32.gmra.mxu3 %v370_v41  ;;  %v349_v43 = vadd.f32 %v619_v1, %v348_v42 }
  0xdb   : > { %432 = vmatmul.f32.gmra.mxu1 %v349_v43 }
  0xde   : > { %v372_v44 = vpop.f32.mrf.mxu2 }
  0xdf   : > { %v373_v45 = vadd.f32 %v619_v1, %v372_v44 }
  0xe0   : > { %v351_v46 = vpop.f32.mrf.mxu0 }
  0xe1   : > { %456 = vmatmul.f32.gmra.mxu3 %v373_v45  ;;  %v352_v47 = vadd.f32 %v619_v1, %v351_v46 }
  0xe3   : > { %435 = vmatmul.f32.gmra.mxu1 %v352_v47 }
  0xe6   : > { %v375_v48 = vpop.f32.mrf.mxu2 }
  0xe7   : > { %v376_v49 = vadd.f32 %v619_v1, %v375_v48 }
  0xe9   : > { %459 = vmatmul.f32.gmra.mxu3 %v376_v49 }
 0x128   : > { %v415_v51 = vpop.f32.mrf.mxu1 }
 0x129   : > { %v416_v52 = vadd.f32 %v860_v50, %v415_v51 }
 0x12b   : > { %v463_v53 = vadd.f32 %v416_v52, %v717_v13 }
 0x12d   : > { %v479_v54 = vmax.f32 %v463_v53, 0.0 }
 0x12f   : > { %495 = vst.msk [vmem:[%s869_s28] sm:$0xff] %vm260_vm0, %v479_v54 }
 0x130   : > { %v418_v55 = vpop.f32.mrf.mxu1 }
 0x131   : > { %v419_v56 = vadd.f32 %v860_v50, %v418_v55 }
 0x133   : > { %v464_v57 = vadd.f32 %v419_v56, %v728_v16 }
 0x134   : > { %v439_v58 = vpop.f32.mrf.mxu3 }
 0x135   : > { %v440_v13 = vadd.f32 %v860_v50, %v439_v58  ;;  %v480_v59 = vmax.f32 %v464_v57, 0.0 }
 0x137   : > { %v471_v60 = vadd.f32 %v440_v13, %v694_v6  ;;  %496 = vst.msk [vmem:[%s869_s28 + $0x8] sm:$0xff] %vm260_vm0, %v480_v59 }
 0x138   : > { %v421_v61 = vpop.f32.mrf.mxu1 }
 0x139   : > { %v487_v62 = vmax.f32 %v471_v60, 0.0  ;;  %v422_v63 = vadd.f32 %v860_v50, %v421_v61 }
 0x13b   : > { %503 = vst.msk [vmem:[%s869_s28 + $0x40] sm:$0xff] %vm260_vm0, %v487_v62  ;;  %v465_v0 = vadd.f32 %v422_v63, %v741_v19 }
 0x13c   : > { %v442_v1 = vpop.f32.mrf.mxu3 }
 0x13d   : > { %v443_v16 = vadd.f32 %v860_v50, %v442_v1  ;;  %v481_v2 = vmax.f32 %v465_v0, 0.0 }
 0x13f   : > { %v472_v3 = vadd.f32 %v443_v16, %v711_v11  ;;  %497 = vst.msk [vmem:[%s869_s28 + $0x10] sm:$0xff] %vm260_vm0, %v481_v2 }
 0x140   : > { %v424_v6 = vpop.f32.mrf.mxu1 }
 0x141   : > { %v488_v4 = vmax.f32 %v472_v3, 0.0  ;;  %v425_v5 = vadd.f32 %v860_v50, %v424_v6 }
 0x143   : > { %504 = vst.msk [vmem:[%s869_s28 + $0x48] sm:$0xff] %vm260_vm0, %v488_v4  ;;  %v466_v7 = vadd.f32 %v425_v5, %v764_v24 }
 0x144   : > { %v445_v8 = vpop.f32.mrf.mxu3 }
 0x145   : > { %v446_v19 = vadd.f32 %v860_v50, %v445_v8  ;;  %v482_v9 = vmax.f32 %v466_v7, 0.0 }
 0x147   : > { %v473_v10 = vadd.f32 %v446_v19, %v720_v14  ;;  %498 = vst.msk [vmem:[%s869_s28 + $0x18] sm:$0xff] %vm260_vm0, %v482_v9 }
 0x148   : > { %v427_v11 = vpop.f32.mrf.mxu1 }
 0x149   : > { %v489_v12 = vmax.f32 %v473_v10, 0.0  ;;  %v428_v15 = vadd.f32 %v860_v50, %v427_v11 }
 0x14b   : > { %505 = vst.msk [vmem:[%s869_s28 + $0x50] sm:$0xff] %vm260_vm0, %v489_v12  ;;  %v467_v18 = vadd.f32 %v428_v15, %v777_v29 }
 0x14c   : > { %v448_v20 = vpop.f32.mrf.mxu3 }
 0x14d   : > { %v449_v24 = vadd.f32 %v860_v50, %v448_v20  ;;  %v483_v22 = vmax.f32 %v467_v18, 0.0 }
 0x14f   : > { %v474_v23 = vadd.f32 %v449_v24, %v733_v17  ;;  %499 = vst.msk [vmem:[%s869_s28 + $0x20] sm:$0xff] %vm260_vm0, %v483_v22 }
 0x150   : > { %v430_v14 = vpop.f32.mrf.mxu1 }
 0x151   : > { %v490_v25 = vmax.f32 %v474_v23, 0.0  ;;  %v431_v26 = vadd.f32 %v860_v50, %v430_v14 }
 0x153   : > { %506 = vst.msk [vmem:[%s869_s28 + $0x58] sm:$0xff] %vm260_vm0, %v490_v25  ;;  %v468_v27 = vadd.f32 %v431_v26, %v787_v33 }
 0x154   : > { %v451_v30 = vpop.f32.mrf.mxu3 }
 0x155   : > { %v452_v29 = vadd.f32 %v860_v50, %v451_v30  ;;  %v484_v31 = vmax.f32 %v468_v27, 0.0 }
 0x157   : > { %v475_v34 = vadd.f32 %v452_v29, %v753_v21  ;;  %500 = vst.msk [vmem:[%s869_s28 + $0x28] sm:$0xff] %vm260_vm0, %v484_v31 }
 0x158   : > { %v433_v17 = vpop.f32.mrf.mxu1 }
 0x159   : > { %v491_v35 = vmax.f32 %v475_v34, 0.0  ;;  %v434_v38 = vadd.f32 %v860_v50, %v433_v17 }
 0x15b   : > { %507 = vst.msk [vmem:[%s869_s28 + $0x60] sm:$0xff] %vm260_vm0, %v491_v35  ;;  %v469_v39 = vadd.f32 %v434_v38, %v797_v37 }
 0x15c   : > { %v454_v41 = vpop.f32.mrf.mxu3 }
 0x15d   : > { %v455_v33 = vadd.f32 %v860_v50, %v454_v41  ;;  %v485_v42 = vmax.f32 %v469_v39, 0.0 }
 0x15f   : > { %v476_v43 = vadd.f32 %v455_v33, %v772_v28  ;;  %501 = vst.msk [vmem:[%s869_s28 + $0x30] sm:$0xff] %vm260_vm0, %v485_v42 }
 0x160   : > { %v436_v21 = vpop.f32.mrf.mxu1 }
 0x161   : > { %v492_v44 = vmax.f32 %v476_v43, 0.0  ;;  %v437_v45 = vadd.f32 %v860_v50, %v436_v21 }
 0x163   : > { %508 = vst.msk [vmem:[%s869_s28 + $0x68] sm:$0xff] %vm260_vm0, %v492_v44  ;;  %v470_v46 = vadd.f32 %v437_v45, %v802_v40 }
 0x164   : > { %v457_v47 = vpop.f32.mrf.mxu3 }
 0x165   : > { %v458_v37 = vadd.f32 %v860_v50, %v457_v47  ;;  %v486_v48 = vmax.f32 %v470_v46, 0.0 }
 0x167   : > { %v477_v49 = vadd.f32 %v458_v37, %v782_v32  ;;  %502 = vst.msk [vmem:[%s869_s28 + $0x38] sm:$0xff] %vm260_vm0, %v486_v48 }
 0x169   : > { %v493_v28 = vmax.f32 %v477_v49, 0.0 }
 0x16b   : > { %509 = vst.msk [vmem:[%s869_s28 + $0x70] sm:$0xff] %vm260_vm0, %v493_v28 }
 0x16c   : > { %v460_v51 = vpop.f32.mrf.mxu3 }
 0x16d   : > { %v461_v52 = vadd.f32 %v860_v50, %v460_v51 }
 0x16f   : > { %v478_v53 = vadd.f32 %v461_v52, %v792_v36 }
 0x171   : > { %v494_v54 = vmax.f32 %v478_v53, 0.0 }
 0x173   : > { %510 = vst.msk [vmem:[%s869_s28 + $0x78] sm:$0xff] %vm260_vm0, %v494_v54 }
 0x174 PF: > { %s15_s18 = sadd.s32 1, %s627_s18  }
 0x175   : > { %p12_p4 = scmp.ge.s32.totalorder %s15_s18, 4  }
 0x177   :  { %14 = sbr.rel (!%p12_p4) target bundleno = 1 (0x1), region = 70 }

// kernel: tpu_custom_call.1
= control target key start
LH: loop header
LB: loop body
LE: loop exit
PB: predicated region body
PF: predicated region fallthrough
CT: control target
= control target key end

     0   :  { %s660_s18 = smov 0   ;;  %s936_s0 = inlined_call_operand.vmem [shape: f32[256,32], index: 0, kind: input, shape index: {}]   ;;  %s937_s1 = inlined_call_operand.vmem [shape: f32[128,128], index: 1, kind: input, shape index: {}]   ;;  %s938_s2 = inlined_call_operand.vmem [shape: f32[1,128], index: 2, kind: input, shape index: {}]   ;;  %s939_s3 = inlined_call_operand.vmem [shape: f32[128,128], index: 3, kind: input, shape index: {}]   ;;  %s940_s4 = inlined_call_operand.vmem [shape: f32[1,128], index: 4, kind: input, shape index: {}]   ;;  %s941_s5 = inlined_call_operand.vmem [shape: f32[256,32], index: 5, kind: output, shape index: {}]  }
   0x1 LB: > { %s567_s19 = sadd.s32 4294967295, %s627_s18   ;;  %p571_p0 = scmp.ge.s32.totalorder %s627_s18, 1  ;;  %s627_s18 = sphi %s660_s18, %s15_s18  }
   0x2   : > { %p188_p1 = scmp.lt.s32.totalorder %s627_s18, 3 }
   0x4   : > { %p189_p2 = pnand %p571_p0, %p188_p1 }
   0x5   : > { %s572_s24 = sshll.u32 (!%p189_p2), %s567_s19, 4 }
   0x6   : > { %192 = sbr.rel (%p189_p2) target bundleno = 372 (0x174), region = 40  ;;  %p217_p3 = scmp.lt.s32.totalorder (!%p189_p2), %s572_s24, 31 }
   0xb   : > { %v308_v0 = vld [vmem:[%s937_s1 + $0x78] sm:$0xff]  ;;  %v307_v1 = vld [vmem:[%s937_s1 + $0x70] sm:$0xff]  ;;  %v629_v2 = vmov 0.0   ;;  %v306_v3 = vld [vmem:[%s937_s1 + $0x68] sm:$0xff]  ;;  %s943_s24 = smov (!%p217_p3, %s572_s24), 31  ;;  %vm260_vm0 = vcmask 261120  }
   0xc   : > { %578 = vmatpush.msra.mxu2 %v308_v0  ;;  %313 = vmatpush.msra.mxu0 %v308_v0  ;;  %252 = vst [vmem:[#allocation2 + $0x40] sm:$0xff] %v629_v2  ;;  %v305_v4 = vld [vmem:[%s937_s1 + $0x60] sm:$0xff]  ;;  %s573_s29 = sshll.u32 %s943_s24, 3  ;;  %v304_v5 = vld [vmem:[%s937_s1 + $0x58] sm:$0xff]  ;;  %v303_v7 = vld [vmem:[%s937_s1 + $0x50] sm:$0xff] }
   0xd   : > { %244 = vst [vmem:[#allocation2] sm:$0xff] %v629_v2  ;;  %s691_s9 = scalar_lea.vmem %s936_s0, %s573_s29  ;;  %v302_v8 = vld [vmem:[%s937_s1 + $0x48] sm:$0xff]  ;;  %v301_v9 = vld [vmem:[%s937_s1 + $0x40] sm:$0xff]  ;;  %v300_v10 = vld [vmem:[%s937_s1 + $0x38] sm:$0xff]  ;;  %s869_s28 = scalar_lea.vmem %s941_s5, %s573_s29 }
   0xe   : > { %579 = vmatpush.msra.mxu2 %v307_v1  ;;  %314 = vmatpush.msra.mxu0 %v307_v1  ;;  %245 = vst [vmem:[#allocation2 + $0x8] sm:$0xff] %v629_v2  ;;  %v694_v6 = vld [vmem:[%s691_s9 + $0x40] sm:$0xff]  ;;  %v711_v11 = vld [vmem:[%s691_s9 + $0x48] sm:$0xff]  ;;  %v299_v12 = vld [vmem:[%s937_s1 + $0x30] sm:$0xff] }
   0xf   : > { %246 = vst [vmem:[#allocation2 + $0x10] sm:$0xff] %v629_v2  ;;  %v717_v13 = vld [vmem:[%s691_s9] sm:$0xff]  ;;  %v720_v14 = vld [vmem:[%s691_s9 + $0x50] sm:$0xff]  ;;  %v298_v15 = vld [vmem:[%s937_s1 + $0x28] sm:$0xff] }
  0x10   : > { %580 = vmatpush.msra.mxu2 %v306_v3  ;;  %315 = vmatpush.msra.mxu0 %v306_v3  ;;  %247 = vst [vmem:[#allocation2 + $0x18] sm:$0xff] %v629_v2  ;;  %v728_v16 = vld [vmem:[%s691_s9 + $0x8] sm:$0xff]  ;;  %v733_v17 = vld [vmem:[%s691_s9 + $0x58] sm:$0xff]  ;;  %v297_v18 = vld [vmem:[%s937_s1 + $0x20] sm:$0xff] }
  0x11   : > { %248 = vst [vmem:[#allocation2 + $0x20] sm:$0xff] %v629_v2  ;;  %v741_v19 = vld [vmem:[%s691_s9 + $0x10] sm:$0xff]  ;;  %v296_v20 = vld [vmem:[%s937_s1 + $0x18] sm:$0xff]  ;;  %v753_v21 = vld [vmem:[%s691_s9 + $0x60] sm:$0xff] }
  0x12   : > { %581 = vmatpush.msra.mxu2 %v305_v4  ;;  %316 = vmatpush.msra.mxu0 %v305_v4  ;;  %249 = vst [vmem:[#allocation2 + $0x28] sm:$0xff] %v629_v2  ;;  %v295_v22 = vld [vmem:[%s937_s1 + $0x10] sm:$0xff]  ;;  %v294_v23 = vld [vmem:[%s937_s1 + $0x8] sm:$0xff]  ;;  %v764_v24 = vld [vmem:[%s691_s9 + $0x18] sm:$0xff] }
  0x13   : > { %269 = vst.msk [vmem:[#allocation2 + $0x40] sm:$0xff] %vm260_vm0, %v694_v6  ;;  %v293_v25 = vld [vmem:[%s937_s1] sm:$0xff]  ;;  %v772_v28 = vld [vmem:[%s691_s9 + $0x68] sm:$0xff]  ;;  %v782_v32 = vld [vmem:[%s691_s9 + $0x70] sm:$0xff] }
  0x14   : > { %582 = vmatpush.msra.mxu2 %v304_v5  ;;  %317 = vmatpush.msra.mxu0 %v304_v5  ;;  %250 = vst [vmem:[#allocation2 + $0x30] sm:$0xff] %v629_v2  ;;  %v777_v29 = vld [vmem:[%s691_s9 + $0x20] sm:$0xff]  ;;  %v787_v33 = vld [vmem:[%s691_s9 + $0x28] sm:$0xff]  ;;  %v792_v36 = vld [vmem:[%s691_s9 + $0x78] sm:$0xff] }
  0x15   : > { %251 = vst [vmem:[#allocation2 + $0x38] sm:$0xff] %v629_v2  ;;  %v797_v37 = vld [vmem:[%s691_s9 + $0x30] sm:$0xff]  ;;  %v802_v40 = vld [vmem:[%s691_s9 + $0x38] sm:$0xff]  ;;  %v391_v43 = vld [vmem:[%s939_s3 + $0x68] sm:$0xff] }
  0x16   : > { %583 = vmatpush.msra.mxu2 %v303_v7  ;;  %318 = vmatpush.msra.mxu0 %v303_v7  ;;  %253 = vst [vmem:[#allocation2 + $0x48] sm:$0xff] %v629_v2  ;;  %v393_v41 = vld [vmem:[%s939_s3 + $0x78] sm:$0xff]  ;;  %v392_v42 = vld [vmem:[%s939_s3 + $0x70] sm:$0xff]  ;;  %v390_v44 = vld [vmem:[%s939_s3 + $0x60] sm:$0xff] }
  0x17   : > { %254 = vst [vmem:[#allocation2 + $0x50] sm:$0xff] %v629_v2  ;;  %594 = vmatpush.msra.mxu3 %v393_v41  ;;  %398 = vmatpush.msra.mxu1 %v393_v41  ;;  %v389_v47 = vld [vmem:[%s939_s3 + $0x58] sm:$0xff]  ;;  %v388_v48 = vld [vmem:[%s939_s3 + $0x50] sm:$0xff]  ;;  %v387_v49 = vld [vmem:[%s939_s3 + $0x48] sm:$0xff] }
  0x18   : > { %584 = vmatpush.msra.mxu2 %v302_v8  ;;  %319 = vmatpush.msra.mxu0 %v302_v8  ;;  %255 = vst [vmem:[#allocation2 + $0x58] sm:$0xff] %v629_v2  ;;  %v386_v50 = vld [vmem:[%s939_s3 + $0x40] sm:$0xff]  ;;  %v385_v53 = vld [vmem:[%s939_s3 + $0x38] sm:$0xff]  ;;  %v384_v54 = vld [vmem:[%s939_s3 + $0x30] sm:$0xff] }
  0x19   : > { %256 = vst [vmem:[#allocation2 + $0x60] sm:$0xff] %v629_v2  ;;  %595 = vmatpush.msra.mxu3 %v392_v42  ;;  %399 = vmatpush.msra.mxu1 %v392_v42  ;;  %v383_v55 = vld [vmem:[%s939_s3 + $0x28] sm:$0xff]  ;;  %v382_v56 = vld [vmem:[%s939_s3 + $0x20] sm:$0xff]  ;;  %v381_v59 = vld [vmem:[%s939_s3 + $0x18] sm:$0xff] }
  0x1a   : > { %585 = vmatpush.msra.mxu2 %v301_v9  ;;  %320 = vmatpush.msra.mxu0 %v301_v9  ;;  %257 = vst [vmem:[#allocation2 + $0x68] sm:$0xff] %v629_v2  ;;  %v285_v26 = vld [vmem:[#allocation2 + $0x40] sm:$0xff]  ;;  %v380_v60 = vld [vmem:[%s939_s3 + $0x10] sm:$0xff]  ;;  %v379_v63 = vld [vmem:[%s939_s3 + $0x8] sm:$0xff] }
  0x1b   : > { %258 = vst [vmem:[#allocation2 + $0x70] sm:$0xff] %v629_v2  ;;  %596 = vmatpush.msra.mxu3 %v391_v43  ;;  %400 = vmatpush.msra.mxu1 %v391_v43  ;;  %v378_v0 = vld [vmem:[%s939_s3] sm:$0xff] }
  0x1c   : > { %586 = vmatpush.msra.mxu2 %v300_v10  ;;  %321 = vmatpush.msra.mxu0 %v300_v10  ;;  %259 = vst [vmem:[#allocation2 + $0x78] sm:$0xff] %v629_v2  ;;  %v619_v1 = vld [vmem:[%s938_s2] ss:$0 sm:$0xff] }
  0x1d   : > { %270 = vst.msk [vmem:[#allocation2 + $0x48] sm:$0xff] %vm260_vm0, %v711_v11  ;;  %597 = vmatpush.msra.mxu3 %v390_v44  ;;  %401 = vmatpush.msra.mxu1 %v390_v44 }
  0x1e   : > { %587 = vmatpush.msra.mxu2 %v299_v12  ;;  %322 = vmatpush.msra.mxu0 %v299_v12  ;;  %261 = vst.msk [vmem:[#allocation2] sm:$0xff] %vm260_vm0, %v717_v13 }
  0x1f   : > { %271 = vst.msk [vmem:[#allocation2 + $0x50] sm:$0xff] %vm260_vm0, %v720_v14  ;;  %598 = vmatpush.msra.mxu3 %v389_v47  ;;  %402 = vmatpush.msra.mxu1 %v389_v47 }
  0x20   : > { %588 = vmatpush.msra.mxu2 %v298_v15  ;;  %323 = vmatpush.msra.mxu0 %v298_v15  ;;  %262 = vst.msk [vmem:[#allocation2 + $0x8] sm:$0xff] %vm260_vm0, %v728_v16 }
  0x21   : > { %272 = vst.msk [vmem:[#allocation2 + $0x58] sm:$0xff] %vm260_vm0, %v733_v17  ;;  %599 = vmatpush.msra.mxu3 %v388_v48  ;;  %403 = vmatpush.msra.mxu1 %v388_v48 }
  0x22   : > { %589 = vmatpush.msra.mxu2 %v297_v18  ;;  %324 = vmatpush.msra.mxu0 %v297_v18  ;;  %263 = vst.msk [vmem:[#allocation2 + $0x10] sm:$0xff] %vm260_vm0, %v741_v19 }
  0x23   : > { %273 = vst.msk [vmem:[#allocation2 + $0x60] sm:$0xff] %vm260_vm0, %v753_v21  ;;  %600 = vmatpush.msra.mxu3 %v387_v49  ;;  %404 = vmatpush.msra.mxu1 %v387_v49 }
  0x24   : > { %590 = vmatpush.msra.mxu2 %v296_v20  ;;  %325 = vmatpush.msra.mxu0 %v296_v20  ;;  %264 = vst.msk [vmem:[#allocation2 + $0x18] sm:$0xff] %vm260_vm0, %v764_v24  ;;  %v286_v30 = vld [vmem:[#allocation2 + $0x48] sm:$0xff] }
  0x25   : > { %v277_v27 = vld [vmem:[#allocation2] sm:$0xff]  ;;  %274 = vst.msk [vmem:[#allocation2 + $0x68] sm:$0xff] %vm260_vm0, %v772_v28  ;;  %601 = vmatpush.msra.mxu3 %v386_v50  ;;  %405 = vmatpush.msra.mxu1 %v386_v50 }
  0x26   : > { %591 = vmatpush.msra.mxu2 %v295_v22  ;;  %326 = vmatpush.msra.mxu0 %v295_v22  ;;  %265 = vst.msk [vmem:[#allocation2 + $0x20] sm:$0xff] %vm260_vm0, %v777_v29  ;;  %v287_v34 = vld [vmem:[#allocation2 + $0x50] sm:$0xff]  ;;  %v860_v50 = vld [vmem:[%s940_s4] ss:$0 sm:$0xff] }
  0x27   : > { %v278_v31 = vld [vmem:[#allocation2 + $0x8] sm:$0xff]  ;;  %275 = vst.msk [vmem:[#allocation2 + $0x70] sm:$0xff] %vm260_vm0, %v782_v32  ;;  %602 = vmatpush.msra.mxu3 %v385_v53  ;;  %406 = vmatpush.msra.mxu1 %v385_v53 }
  0x28   : > { %592 = vmatpush.msra.mxu2 %v294_v23  ;;  %327 = vmatpush.msra.mxu0 %v294_v23  ;;  %266 = vst.msk [vmem:[#allocation2 + $0x28] sm:$0xff] %vm260_vm0, %v787_v33  ;;  %v288_v38 = vld [vmem:[#allocation2 + $0x58] sm:$0xff] }
  0x29   : > { %v279_v35 = vld [vmem:[#allocation2 + $0x10] sm:$0xff]  ;;  %276 = vst.msk [vmem:[#allocation2 + $0x78] sm:$0xff] %vm260_vm0, %v792_v36  ;;  %603 = vmatpush.msra.mxu3 %v384_v54  ;;  %407 = vmatpush.msra.mxu1 %v384_v54 }
  0x2a   : > { %593 = vmatpush.msra.mxu2 %v293_v25  ;;  %328 = vmatpush.msra.mxu0 %v293_v25  ;;  %267 = vst.msk [vmem:[#allocation2 + $0x30] sm:$0xff] %vm260_vm0, %v797_v37  ;;  %v289_v45 = vld [vmem:[#allocation2 + $0x60] sm:$0xff] }
  0x2b   : > { %353 = vmatmul.f32.vlgmr.msra.gmra.mxu2 %v285_v26  ;;  %329 = vmatmul.f32.vlgmr.msra.gmra.mxu0 %v277_v27  ;;  %v280_v39 = vld [vmem:[#allocation2 + $0x18] sm:$0xff]  ;;  %268 = vst.msk [vmem:[#allocation2 + $0x38] sm:$0xff] %vm260_vm0, %v802_v40 }
  0x2c   : > { %v290_v51 = vld [vmem:[#allocation2 + $0x68] sm:$0xff]  ;;  %604 = vmatpush.msra.mxu3 %v383_v55  ;;  %408 = vmatpush.msra.mxu1 %v383_v55 }
  0x2d   : > { %v281_v46 = vld [vmem:[#allocation2 + $0x20] sm:$0xff] }
  0x2e   : > { %v291_v57 = vld [vmem:[#allocation2 + $0x70] sm:$0xff]  ;;  %605 = vmatpush.msra.mxu3 %v382_v56  ;;  %409 = vmatpush.msra.mxu1 %v382_v56 }
  0x2f   : > { %v282_v52 = vld [vmem:[#allocation2 + $0x28] sm:$0xff] }
  0x30   : > { %606 = vmatpush.msra.mxu3 %v381_v59  ;;  %410 = vmatpush.msra.mxu1 %v381_v59  ;;  %v292_v61 = vld [vmem:[#allocation2 + $0x78] sm:$0xff] }
  0x31   : > { %v283_v58 = vld [vmem:[#allocation2 + $0x30] sm:$0xff] }
  0x32   : > { %607 = vmatpush.msra.mxu3 %v380_v60  ;;  %411 = vmatpush.msra.mxu1 %v380_v60  ;;  %v284_v62 = vld [vmem:[#allocation2 + $0x38] sm:$0xff] }
  0x33   : > { %356 = vmatmul.f32.gmra.mxu2 %v286_v30  ;;  %332 = vmatmul.f32.gmra.mxu0 %v278_v31 }
  0x34   : > { %608 = vmatpush.msra.mxu3 %v379_v63  ;;  %412 = vmatpush.msra.mxu1 %v379_v63 }
  0x36   : > { %609 = vmatpush.msra.mxu3 %v378_v0  ;;  %413 = vmatpush.msra.mxu1 %v378_v0 }
  0x3b   : > { %359 = vmatmul.f32.gmra.mxu2 %v287_v34  ;;  %335 = vmatmul.f32.gmra.mxu0 %v279_v35 }
  0x43   : > { %362 = vmatmul.f32.gmra.mxu2 %v288_v38  ;;  %338 = vmatmul.f32.gmra.mxu0 %v280_v39 }
  0x4b   : > { %365 = vmatmul.f32.gmra.mxu2 %v289_v45  ;;  %341 = vmatmul.f32.gmra.mxu0 %v281_v46 }
  0x53   : > { %368 = vmatmul.f32.gmra.mxu2 %v290_v51  ;;  %344 = vmatmul.f32.gmra.mxu0 %v282_v52 }
  0x5b   : > { %371 = vmatmul.f32.gmra.mxu2 %v291_v57  ;;  %347 = vmatmul.f32.gmra.mxu0 %v283_v58 }
  0x63   : > { %374 = vmatmul.f32.gmra.mxu2 %v292_v61  ;;  %350 = vmatmul.f32.gmra.mxu0 %v284_v62 }
  0xa8   : > { %v330_v2 = vpop.f32.mrf.mxu0 }
  0xa9   : > { %v331_v3 = vadd.f32 %v619_v1, %v330_v2 }
  0xab   : > { %414 = vmatmul.f32.vlgmr.msra.gmra.mxu1 %v331_v3 }
  0xae   : > { %v354_v4 = vpop.f32.mrf.mxu2 }
  0xaf   : > { %v355_v5 = vadd.f32 %v619_v1, %v354_v4 }
  0xb0   : > { %v333_v7 = vpop.f32.mrf.mxu0 }
  0xb1   : > { %438 = vmatmul.f32.vlgmr.msra.gmra.mxu3 %v355_v5  ;;  %v334_v8 = vadd.f32 %v619_v1, %v333_v7 }
  0xb3   : > { %417 = vmatmul.f32.gmra.mxu1 %v334_v8 }
  0xb6   : > { %v357_v9 = vpop.f32.mrf.mxu2 }
  0xb7   : > { %v358_v10 = vadd.f32 %v619_v1, %v357_v9 }
  0xb8   : > { %v336_v12 = vpop.f32.mrf.mxu0 }
  0xb9   : > { %441 = vmatmul.f32.gmra.mxu3 %v358_v10  ;;  %v337_v15 = vadd.f32 %v619_v1, %v336_v12 }
  0xbb   : > { %420 = vmatmul.f32.gmra.mxu1 %v337_v15 }
  0xbe   : > { %v360_v18 = vpop.f32.mrf.mxu2 }
  0xbf   : > { %v361_v20 = vadd.f32 %v619_v1, %v360_v18 }
  0xc0   : > { %v339_v22 = vpop.f32.mrf.mxu0 }
  0xc1   : > { %444 = vmatmul.f32.gmra.mxu3 %v361_v20  ;;  %v340_v23 = vadd.f32 %v619_v1, %v339_v22 }
  0xc3   : > { %423 = vmatmul.f32.gmra.mxu1 %v340_v23 }
  0xc6   : > { %v363_v25 = vpop.f32.mrf.mxu2 }
  0xc7   : > { %v364_v26 = vadd.f32 %v619_v1, %v363_v25 }
  0xc8   : > { %v342_v27 = vpop.f32.mrf.mxu0 }
  0xc9   : > { %447 = vmatmul.f32.gmra.mxu3 %v364_v26  ;;  %v343_v30 = vadd.f32 %v619_v1, %v342_v27 }
  0xcb   : > { %426 = vmatmul.f32.gmra.mxu1 %v343_v30 }
  0xce   : > { %v366_v31 = vpop.f32.mrf.mxu2 }
  0xcf   : > { %v367_v34 = vadd.f32 %v619_v1, %v366_v31 }
  0xd0   : > { %v345_v35 = vpop.f32.mrf.mxu0 }
  0xd1   : > { %450 = vmatmul.f32.gmra.mxu3 %v367_v34  ;;  %v346_v38 = vadd.f32 %v619_v1, %v345_v35 }
  0xd3   : > { %429 = vmatmul.f32.gmra.mxu1 %v346_v38 }
  0xd6   : > { %v369_v39 = vpop.f32.mrf.mxu2 }
  0xd7   : > { %v370_v41 = vadd.f32 %v619_v1, %v369_v39 }
  0xd8   : > { %v348_v42 = vpop.f32.mrf.mxu0 }
  0xd9   : > { %453 = vmatmul.f32.gmra.mxu3 %v370_v41  ;;  %v349_v43 = vadd.f32 %v619_v1, %v348_v42 }
  0xdb   : > { %432 = vmatmul.f32.gmra.mxu1 %v349_v43 }
  0xde   : > { %v372_v44 = vpop.f32.mrf.mxu2 }
  0xdf   : > { %v373_v45 = vadd.f32 %v619_v1, %v372_v44 }
  0xe0   : > { %v351_v46 = vpop.f32.mrf.mxu0 }
  0xe1   : > { %456 = vmatmul.f32.gmra.mxu3 %v373_v45  ;;  %v352_v47 = vadd.f32 %v619_v1, %v351_v46 }
  0xe3   : > { %435 = vmatmul.f32.gmra.mxu1 %v352_v47 }
  0xe6   : > { %v375_v48 = vpop.f32.mrf.mxu2 }
  0xe7   : > { %v376_v49 = vadd.f32 %v619_v1, %v375_v48 }
  0xe9   : > { %459 = vmatmul.f32.gmra.mxu3 %v376_v49 }
 0x128   : > { %v415_v51 = vpop.f32.mrf.mxu1 }
 0x129   : > { %v416_v52 = vadd.f32 %v860_v50, %v415_v51 }
 0x12b   : > { %v463_v53 = vadd.f32 %v416_v52, %v717_v13 }
 0x12d   : > { %v479_v54 = vmax.f32 %v463_v53, 0.0 }
 0x12f   : > { %495 = vst.msk [vmem:[%s869_s28] sm:$0xff] %vm260_vm0, %v479_v54 }
 0x130   : > { %v418_v55 = vpop.f32.mrf.mxu1 }
 0x131   : > { %v419_v56 = vadd.f32 %v860_v50, %v418_v55 }
 0x133   : > { %v464_v57 = vadd.f32 %v419_v56, %v728_v16 }
 0x134   : > { %v439_v58 = vpop.f32.mrf.mxu3 }
 0x135   : > { %v440_v13 = vadd.f32 %v860_v50, %v439_v58  ;;  %v480_v59 = vmax.f32 %v464_v57, 0.0 }
 0x137   : > { %v471_v60 = vadd.f32 %v440_v13, %v694_v6  ;;  %496 = vst.msk [vmem:[%s869_s28 + $0x8] sm:$0xff] %vm260_vm0, %v480_v59 }
 0x138   : > { %v421_v61 = vpop.f32.mrf.mxu1 }
 0x139   : > { %v487_v62 = vmax.f32 %v471_v60, 0.0  ;;  %v422_v63 = vadd.f32 %v860_v50, %v421_v61 }
 0x13b   : > { %503 = vst.msk [vmem:[%s869_s28 + $0x40] sm:$0xff] %vm260_vm0, %v487_v62  ;;  %v465_v0 = vadd.f32 %v422_v63, %v741_v19 }
 0x13c   : > { %v442_v1 = vpop.f32.mrf.mxu3 }
 0x13d   : > { %v443_v16 = vadd.f32 %v860_v50, %v442_v1  ;;  %v481_v2 = vmax.f32 %v465_v0, 0.0 }
 0x13f   : > { %v472_v3 = vadd.f32 %v443_v16, %v711_v11  ;;  %497 = vst.msk [vmem:[%s869_s28 + $0x10] sm:$0xff] %vm260_vm0, %v481_v2 }
 0x140   : > { %v424_v6 = vpop.f32.mrf.mxu1 }
 0x141   : > { %v488_v4 = vmax.f32 %v472_v3, 0.0  ;;  %v425_v5 = vadd.f32 %v860_v50, %v424_v6 }
 0x143   : > { %504 = vst.msk [vmem:[%s869_s28 + $0x48] sm:$0xff] %vm260_vm0, %v488_v4  ;;  %v466_v7 = vadd.f32 %v425_v5, %v764_v24 }
 0x144   : > { %v445_v8 = vpop.f32.mrf.mxu3 }
 0x145   : > { %v446_v19 = vadd.f32 %v860_v50, %v445_v8  ;;  %v482_v9 = vmax.f32 %v466_v7, 0.0 }
 0x147   : > { %v473_v10 = vadd.f32 %v446_v19, %v720_v14  ;;  %498 = vst.msk [vmem:[%s869_s28 + $0x18] sm:$0xff] %vm260_vm0, %v482_v9 }
 0x148   : > { %v427_v11 = vpop.f32.mrf.mxu1 }
 0x149   : > { %v489_v12 = vmax.f32 %v473_v10, 0.0  ;;  %v428_v15 = vadd.f32 %v860_v50, %v427_v11 }
 0x14b   : > { %505 = vst.msk [vmem:[%s869_s28 + $0x50] sm:$0xff] %vm260_vm0, %v489_v12  ;;  %v467_v18 = vadd.f32 %v428_v15, %v777_v29 }
 0x14c   : > { %v448_v20 = vpop.f32.mrf.mxu3 }
 0x14d   : > { %v449_v24 = vadd.f32 %v860_v50, %v448_v20  ;;  %v483_v22 = vmax.f32 %v467_v18, 0.0 }
 0x14f   : > { %v474_v23 = vadd.f32 %v449_v24, %v733_v17  ;;  %499 = vst.msk [vmem:[%s869_s28 + $0x20] sm:$0xff] %vm260_vm0, %v483_v22 }
 0x150   : > { %v430_v14 = vpop.f32.mrf.mxu1 }
 0x151   : > { %v490_v25 = vmax.f32 %v474_v23, 0.0  ;;  %v431_v26 = vadd.f32 %v860_v50, %v430_v14 }
 0x153   : > { %506 = vst.msk [vmem:[%s869_s28 + $0x58] sm:$0xff] %vm260_vm0, %v490_v25  ;;  %v468_v27 = vadd.f32 %v431_v26, %v787_v33 }
 0x154   : > { %v451_v30 = vpop.f32.mrf.mxu3 }
 0x155   : > { %v452_v29 = vadd.f32 %v860_v50, %v451_v30  ;;  %v484_v31 = vmax.f32 %v468_v27, 0.0 }
 0x157   : > { %v475_v34 = vadd.f32 %v452_v29, %v753_v21  ;;  %500 = vst.msk [vmem:[%s869_s28 + $0x28] sm:$0xff] %vm260_vm0, %v484_v31 }
 0x158   : > { %v433_v17 = vpop.f32.mrf.mxu1 }
 0x159   : > { %v491_v35 = vmax.f32 %v475_v34, 0.0  ;;  %v434_v38 = vadd.f32 %v860_v50, %v433_v17 }
 0x15b   : > { %507 = vst.msk [vmem:[%s869_s28 + $0x60] sm:$0xff] %vm260_vm0, %v491_v35  ;;  %v469_v39 = vadd.f32 %v434_v38, %v797_v37 }
 0x15c   : > { %v454_v41 = vpop.f32.mrf.mxu3 }
 0x15d   : > { %v455_v33 = vadd.f32 %v860_v50, %v454_v41  ;;  %v485_v42 = vmax.f32 %v469_v39, 0.0 }
 0x15f   : > { %v476_v43 = vadd.f32 %v455_v33, %v772_v28  ;;  %501 = vst.msk [vmem:[%s869_s28 + $0x30] sm:$0xff] %vm260_vm0, %v485_v42 }
 0x160   : > { %v436_v21 = vpop.f32.mrf.mxu1 }
 0x161   : > { %v492_v44 = vmax.f32 %v476_v43, 0.0  ;;  %v437_v45 = vadd.f32 %v860_v50, %v436_v21 }
 0x163   : > { %508 = vst.msk [vmem:[%s869_s28 + $0x68] sm:$0xff] %vm260_vm0, %v492_v44  ;;  %v470_v46 = vadd.f32 %v437_v45, %v802_v40 }
 0x164   : > { %v457_v47 = vpop.f32.mrf.mxu3 }
 0x165   : > { %v458_v37 = vadd.f32 %v860_v50, %v457_v47  ;;  %v486_v48 = vmax.f32 %v470_v46, 0.0 }
 0x167   : > { %v477_v49 = vadd.f32 %v458_v37, %v782_v32  ;;  %502 = vst.msk [vmem:[%s869_s28 + $0x38] sm:$0xff] %vm260_vm0, %v486_v48 }
 0x169   : > { %v493_v28 = vmax.f32 %v477_v49, 0.0 }
 0x16b   : > { %509 = vst.msk [vmem:[%s869_s28 + $0x70] sm:$0xff] %vm260_vm0, %v493_v28 }
 0x16c   : > { %v460_v51 = vpop.f32.mrf.mxu3 }
 0x16d   : > { %v461_v52 = vadd.f32 %v860_v50, %v460_v51 }
 0x16f   : > { %v478_v53 = vadd.f32 %v461_v52, %v792_v36 }
 0x171   : > { %v494_v54 = vmax.f32 %v478_v53, 0.0 }
 0x173   : > { %510 = vst.msk [vmem:[%s869_s28 + $0x78] sm:$0xff] %vm260_vm0, %v494_v54 }
 0x174 PF: > { %s15_s18 = sadd.s32 1, %s627_s18  }
 0x175   : > { %p12_p4 = scmp.ge.s32.totalorder %s15_s18, 4  }
 0x177   :  { %14 = sbr.rel (!%p12_p4) target bundleno = 1 (0x1), region = 70 }

</bundles_post_ra>
